<compile_context>
chip_gen: v6e
topology: v6e:2x2x1
jax: 0.10.0
libtpu: 0.0.40
codegen_flags: <defaults>
</compile_context>

<pallas_src>
import jax
import jax.numpy as jnp
from jax.experimental import pallas as pl
from jax.experimental.pallas import tpu as pltpu

_LANE = 1024  # 8 sublanes x 128 lanes of f32 -> lane-dense slab, unmasked stores


def _abs_diff_kernel(out_ref, label_ref, loss_ref):
    # Elementwise hot path: |label - out| on the current VMEM tile (VPU).
    loss_ref[...] = jnp.abs(label_ref[...] - out_ref[...])


def _round_up(x, m):
    return ((x + m - 1) // m) * m


def test_loss(out, label, *, block_rows=None, min_pallas_elems=1 << 18,
              donate_out=False):
    """Computes |label - out| with a tiled Pallas kernel. Same shape/dtype as `out`."""
    assert out.shape == label.shape and out.dtype == label.dtype
    orig_shape = out.shape
    n = out.size
    itemsize = out.dtype.itemsize
    # Sublane multiple scales with dtype packing: 8 (f32), 16 (bf16), 32 (int8/fp8).
    sub = 8 * max(1, 4 // itemsize)

    # Tiny inputs: the fixed pallas_call launch cost dominates; fused XLA is faster.
    if n < max(min_pallas_elems, _LANE):
        return jnp.abs(label - out)

    # Default block ~2 MiB per input regardless of dtype; clamp any caller
    # override so the double-buffered footprint (2 in + 1 out) stays <= 24 MiB.
    if block_rows is None:
        block_rows = ((2 << 20) // (_LANE * itemsize)) // sub * sub
    else:
        block_rows = _round_up(block_rows, sub)
    max_br = ((24 << 20) // (3 * 2 * _LANE * itemsize)) // sub * sub
    block_rows = max(sub, min(block_rows, max_br))

    out_flat = out.reshape(-1)
    label_flat = label.reshape(-1)

    # Lane-aligned prefix goes through Pallas; the <1024-element tail is handled
    # by plain XLA (no full-array pad, no full-output slice).
    n_aligned = n - (n % _LANE)
    rows = n_aligned // _LANE
    if rows == 0:
        return jnp.abs(label - out)
    out2d = out_flat[:n_aligned].reshape(rows, _LANE)
    label2d = label_flat[:n_aligned].reshape(rows, _LANE)

    # Cap the block so the grid has >= ~4 steps: keeps the DMA/compute pipeline
    # busy and lets the "parallel" axis shard across both v7x TensorCores.
    br = min(block_rows, max(sub, _round_up(pl.cdiv(rows, 4), sub)))
    grid = (pl.cdiv(rows, br),)  # ragged tail block handled/masked by the pipeline
    block = (br, _LANE)

    params_kwargs = dict(dimension_semantics=("parallel",))
    vmem_need = 3 * 2 * br * _LANE * itemsize  # 2 in + 1 out, double-buffered
    if vmem_need > (12 << 20):
        # Cap at 32 MiB: safe on every generation (v7x has only 64 MiB VMEM / TC).
        params_kwargs["vmem_limit_bytes"] = min(int(vmem_need) + (4 << 20), 32 << 20)

    call_kwargs = {}
    if donate_out:
        # Opt-in: reuse `out`'s HBM allocation for the loss (caller must not
        # reuse `out` afterwards).
        call_kwargs["input_output_aliases"] = {0: 0}

    loss2d = pl.pallas_call(
        _abs_diff_kernel,
        out_shape=jax.ShapeDtypeStruct((rows, _LANE), out.dtype),
        grid_spec=pltpu.PrefetchScalarGridSpec(
            num_scalar_prefetch=0,
            grid=grid,
            in_specs=[
                pl.BlockSpec(block, lambda i: (i, 0)),
                pl.BlockSpec(block, lambda i: (i, 0)),
            ],
            out_specs=pl.BlockSpec(block, lambda i: (i, 0)),
        ),
        compiler_params=pltpu.CompilerParams(**params_kwargs),
        **call_kwargs,
    )(out2d, label2d)

    loss_flat = loss2d.reshape(-1)
    if n_aligned != n:
        tail = jnp.abs(label_flat[n_aligned:] - out_flat[n_aligned:])
        loss_flat = jnp.concatenate([loss_flat, tail])
    return loss_flat.reshape(orig_shape)


if __name__ == "__main__":
    key = jax.random.PRNGKey(0)
    k1, k2, k3, k4, k5, k6 = jax.random.split(key, 6)

    # Case 1: small NCHW pair (spec-sized), forcing the Pallas path.
    B, C, H, W = 2, 4, 16, 16
    out1 = jax.random.normal(k1, (B, C, H, W), dtype=jnp.float32)
    lab1 = jax.random.normal(k2, (B, C, H, W), dtype=jnp.float32)
    loss1 = jax.block_until_ready(test_loss(out1, lab1, min_pallas_elems=0))
    ref1 = jnp.abs(lab1 - out1)
    assert loss1.shape == ref1.shape and loss1.dtype == ref1.dtype
    assert jnp.array_equal(loss1, ref1)

    # Case 2: size not a multiple of 1024 -> lane-aligned prefix through Pallas
    # (multi-step grid with a ragged tail block) + XLA tail, no full-array pad.
    out2 = jax.random.normal(k3, (2, 3, 37, 53), dtype=jnp.float32)
    lab2 = jax.random.normal(k4, (2, 3, 37, 53), dtype=jnp.float32)
    loss2 = jax.block_until_ready(
        test_loss(out2, lab2, min_pallas_elems=0, block_rows=8)
    )
    assert jnp.array_equal(loss2, jnp.abs(lab2 - out2))

    # Case 3: moderate size, default blocks; the >=4-step grid cap keeps the
    # pipeline and (on v7x) both TensorCores busy.
    out3 = jax.random.normal(k5, (2, 8, 256, 256), dtype=jnp.float32)
    lab3 = jax.random.normal(k6, (2, 8, 256, 256), dtype=jnp.float32)
    loss3 = jax.block_until_ready(test_loss(out3, lab3))
    assert jnp.array_equal(loss3, jnp.abs(lab3 - out3))

    # Case 4: tiny-input fallback path (no Pallas launch).
    loss4 = jax.block_until_ready(test_loss(out1, lab1))
    assert jnp.array_equal(loss4, ref1)

    print("KERNEL_OK")
</pallas_src>

<mosaic_0001>
module attributes {stable_mosaic.version = 11 : i64} {
  func.func @_abs_diff_kernel(%arg0: i32, %arg1: memref<8x1024xf32, #tpu.memory_space<vmem>>, %arg2: memref<8x1024xf32, #tpu.memory_space<vmem>>, %arg3: memref<8x1024xf32, #tpu.memory_space<vmem>>) attributes {dimension_semantics = [#tpu.dimension_semantics<parallel>], iteration_bounds = array<i64: 1>, scalar_prefetch = 0 : i64, scratch_operands = 0 : i64, tpu.core_type = #tpu.core_type<tc>, window_params = [{transform_indices = @transform_0, window_bounds = array<i64: 8, 1024>}, {transform_indices = @transform_1, window_bounds = array<i64: 8, 1024>}, {transform_indices = @transform_2, window_bounds = array<i64: 8, 1024>}]} {
    %c0 = arith.constant 0 : index
    %c0_0 = arith.constant 0 : index
    %0 = vector.load %arg2[%c0, %c0_0] : memref<8x1024xf32, #tpu.memory_space<vmem>>, vector<8x1024xf32>
    %c0_1 = arith.constant 0 : index
    %c0_2 = arith.constant 0 : index
    %1 = vector.load %arg1[%c0_1, %c0_2] : memref<8x1024xf32, #tpu.memory_space<vmem>>, vector<8x1024xf32>
    %2 = arith.subf %0, %1 : vector<8x1024xf32>
    %3 = math.absf %2 : vector<8x1024xf32>
    %c0_3 = arith.constant 0 : index
    %c0_4 = arith.constant 0 : index
    %4 = vector.load %arg3[%c0_3, %c0_4] : memref<8x1024xf32, #tpu.memory_space<vmem>>, vector<8x1024xf32>
    tpu.vector_store %arg3[%c0_3, %c0_4], %3 {strides = array<i32>} : memref<8x1024xf32, #tpu.memory_space<vmem>>, vector<8x1024xf32>,
    return
  }
  func.func @transform_0(%arg0: i32) -> (i32, i32) {
    %c0_i32 = arith.constant 0 : i32
    %c0_i32_0 = arith.constant 0 : i32
    return %arg0, %c0_i32 : i32, i32
  }
  func.func @transform_1(%arg0: i32) -> (i32, i32) {
    %c0_i32 = arith.constant 0 : i32
    %c0_i32_0 = arith.constant 0 : i32
    return %arg0, %c0_i32 : i32, i32
  }
  func.func @transform_2(%arg0: i32) -> (i32, i32) {
    %c0_i32 = arith.constant 0 : i32
    %c0_i32_0 = arith.constant 0 : i32
    return %arg0, %c0_i32 : i32, i32
  }
}

</mosaic_0001>

<bundles_post_ra>
// kernel: tpu_custom_call.1
= control target key start
LH: loop header
LB: loop body
LE: loop exit
PB: predicated region body
PF: predicated region fallthrough
CT: control target
= control target key end

     0   :  { %7 = vsyncpa [#allocation3], 0  ;;  %s207_s0 = inlined_call_operand.hbm [shape: f32[2,1024], index: 0, kind: input, shape index: {}]   ;;  %s208_s1 = inlined_call_operand.hbm [shape: f32[2,1024], index: 1, kind: input, shape index: {}]   ;;  %s209_s2 = inlined_call_operand.hbm [shape: f32[2,1024], index: 2, kind: output, shape index: {}]  }
   0x1   :  { %8 = vsyncpa [#allocation6], 0 }
   0x2   :  { %9 = vsyncpa [#allocation4], 0 }
   0x3   :  { %14 = vsyncadd [#allocation3], 768  ;;  %s169_s9 = smov [#allocation2]  }
   0x4   :  { %s15_s10 = sshll.u32 %s169_s9, 4  ;;  %s16_s10 = int_to_ptr.vmem [resolvable:$true] %s15_s10 }
   0x5   :  { %s111_s11 = scalar_lea.vmem %s16_s10, 256  ;;  %s115_s12 = scalar_lea.vmem %s16_s10, 1024 }
   0x6   :  { %p112_p0 = scmp.ne.s32.totalorder %s16_s10, %s111_s11  ;;  %p116_p1 = scmp.lt.s32.totalorder %s16_s10, %s16_s10 }
   0x7   :  { %p117_p2 = scmp.lt.s32.totalorder %s115_s12, %s111_s11 }
   0x9   :  { %p118_p3 = por %p117_p2, %p116_p1 }
   0xb   :  { %p119_p4 = pnand %p118_p3, %p112_p0 }
   0xd   :  { %122 = shalt.err (!%p119_p4)
}
   0xe   :  { %s170_s13 = smov 256   ;;  %s171_s14 = smov 16  }
   0xf   :  { %21 = dma.hbm_to_vmem [thread:$0]  %s207_s0, 256, %s16_s10, [#allocation3], %s170_s13, %s170_s13, %s171_s14  }
  0x10   :  { %26 = vsyncadd [#allocation6], 768  ;;  %s172_s17 = smov [#allocation5]  }
  0x11   :  { %s27_s18 = sshll.u32 %s172_s17, 4  ;;  %s28_s18 = int_to_ptr.vmem [resolvable:$true] %s27_s18 }
  0x12   :  { %s131_s19 = scalar_lea.vmem %s28_s18, 256  ;;  %s135_s20 = scalar_lea.vmem %s28_s18, 1024 }
  0x13   :  { %p132_p5 = scmp.ne.s32.totalorder %s28_s18, %s131_s19  ;;  %p136_p6 = scmp.lt.s32.totalorder %s28_s18, %s28_s18 }
  0x14   :  { %p137_p7 = scmp.lt.s32.totalorder %s135_s20, %s131_s19 }
  0x16   :  { %p138_p8 = por %p137_p7, %p136_p6 }
  0x18   :  { %p139_p9 = pnand %p138_p8, %p132_p5 }
  0x1a   :  { %142 = shalt.err (!%p139_p9)
}
  0x1b   :  { %33 = dma.hbm_to_vmem [thread:$0]  %s208_s1, 256, %s28_s18, [#allocation6], %s170_s13, %s170_s13, %s171_s14  }
  0x1c   :  { %163 = dma.done.wait [#allocation3], 1024  }
  0x1d   :  { %164 = vsyncadd [#allocation3], 4294966272 }
  0x1e   :  { %165 = dma.done.wait [#allocation6], 1024  }
  0x1f   :  { %166 = vsyncadd [#allocation6], 4294966272  ;;  %v40_v0 = vld [vmem:[#allocation5] sm:$0xff]  ;;  %v41_v2 = vld [vmem:[#allocation5 + $0x8] sm:$0xff] }
  0x20   :  { %v48_v1 = vld [vmem:[#allocation2] sm:$0xff]  ;;  %v49_v4 = vld [vmem:[#allocation2 + $0x8] sm:$0xff]  ;;  %v42_v5 = vld [vmem:[#allocation5 + $0x10] sm:$0xff] }
  0x21   :  { %v56_v3 = vsub.f32 %v40_v0, %v48_v1  ;;  %v50_v6 = vld [vmem:[#allocation2 + $0x10] sm:$0xff]  ;;  %v57_v7 = vsub.f32 %v41_v2, %v49_v4  ;;  %v43_v9 = vld [vmem:[#allocation5 + $0x18] sm:$0xff]  ;;  %v44_v11 = vld [vmem:[#allocation5 + $0x20] sm:$0xff] }
  0x22   :  { %v58_v8 = vsub.f32 %v42_v5, %v50_v6  ;;  %v51_v10 = vld [vmem:[#allocation2 + $0x18] sm:$0xff]  ;;  %v52_v14 = vld [vmem:[#allocation2 + $0x20] sm:$0xff]  ;;  %v45_v15 = vld [vmem:[#allocation5 + $0x28] sm:$0xff] }
  0x23   :  { %v64_v12 = vand.u32 2147483647, %v56_v3  ;;  %v59_v13 = vsub.f32 %v43_v9, %v51_v10  ;;  %v53_v16 = vld [vmem:[#allocation2 + $0x28] sm:$0xff]  ;;  %v65_v17 = vand.u32 2147483647, %v57_v7  ;;  %v60_v19 = vsub.f32 %v44_v11, %v52_v14  ;;  %v46_v21 = vld [vmem:[#allocation5 + $0x30] sm:$0xff] }
  0x24   :  { %v66_v18 = vand.u32 2147483647, %v58_v8  ;;  %v61_v20 = vsub.f32 %v45_v15, %v53_v16  ;;  %v54_v22 = vld [vmem:[#allocation2 + $0x30] sm:$0xff]  ;;  %v47_v25 = vld [vmem:[#allocation5 + $0x38] sm:$0xff] }
  0x25   :  { %72 = vst [vmem:[#allocation7] sm:$0xff] %v64_v12  ;;  %v67_v23 = vand.u32 2147483647, %v59_v13  ;;  %v62_v24 = vsub.f32 %v46_v21, %v54_v22  ;;  %v55_v26 = vld [vmem:[#allocation2 + $0x38] sm:$0xff]  ;;  %73 = vst [vmem:[#allocation7 + $0x8] sm:$0xff] %v65_v17 }
  0x26   :  { %74 = vst [vmem:[#allocation7 + $0x10] sm:$0xff] %v66_v18  ;;  %v68_v27 = vand.u32 2147483647, %v60_v19  ;;  %v69_v28 = vand.u32 2147483647, %v61_v20  ;;  %v63_v29 = vsub.f32 %v47_v25, %v55_v26 }
  0x27   :  { %75 = vst [vmem:[#allocation7 + $0x18] sm:$0xff] %v67_v23  ;;  %v70_v30 = vand.u32 2147483647, %v62_v24 }
  0x28   :  { %76 = vst [vmem:[#allocation7 + $0x20] sm:$0xff] %v68_v27  ;;  %77 = vst [vmem:[#allocation7 + $0x28] sm:$0xff] %v69_v28  ;;  %v71_v31 = vand.u32 2147483647, %v63_v29 }
  0x29   :  { %78 = vst [vmem:[#allocation7 + $0x30] sm:$0xff] %v70_v30 }
  0x2a   :  { %79 = vst [vmem:[#allocation7 + $0x38] sm:$0xff] %v71_v31 }
  0x2b   :  { %84 = vsyncadd [#allocation4], 768  ;;  %s173_s0 = smov [#allocation7]  }
  0x2c   :  { %s85_s1 = sshll.u32 %s173_s0, 4  ;;  %s86_s1 = int_to_ptr.vmem [resolvable:$true] %s85_s1 }
  0x2d   :  { %s143_s23 = scalar_lea.vmem %s86_s1, 256  ;;  %s147_s24 = scalar_lea.vmem %s86_s1, 1024 }
  0x2e   :  { %p144_p10 = scmp.ne.s32.totalorder %s86_s1, %s143_s23  ;;  %p148_p11 = scmp.lt.s32.totalorder %s86_s1, %s86_s1 }
  0x2f   :  { %p149_p12 = scmp.lt.s32.totalorder %s147_s24, %s143_s23 }
  0x31   :  { %p150_p13 = por %p149_p12, %p148_p11 }
  0x33   :  { %p151_p0 = pnand %p150_p13, %p144_p10 }
  0x35   :  { %154 = shalt.err (!%p151_p0)
}
  0x36   :  { %91 = dma.vmem_to_hbm [thread:$0]  %s86_s1, 256, %s209_s2, [#allocation4], %s170_s13, %s170_s13, %s171_s14  }
  0x37   :  { %167 = dma.done.wait [#allocation4], 1024  }
  0x38   :  { %168 = vsyncadd [#allocation4], 4294966272 }
  0x39   :  { %95 = vsyncpa [#allocation3], 1 }
  0x3a   :  { %96 = vsyncpa [#allocation6], 1 }
  0x3b   :  { %97 = vsyncpa [#allocation4], 1 }

</bundles_post_ra>
